<compile_context>
chip_gen: v7x
topology: tpu7x:2x2x1
jax: 0.10.0
libtpu: 0.0.40
codegen_flags: <defaults>
</compile_context>

<pallas_src>
import jax
import jax.numpy as jnp
from jax import lax
from jax.experimental import pallas as pl
from jax.experimental.pallas import tpu as pltpu


_LANE = 128
# Per-input block byte target.  x2 double buffering => ~8 MiB of pred buffers,
# plus the (tb,128) f32 accumulator and temps: comfortably under v5e's 16 MiB
# scoped-VMEM default and v7x's 32 MiB scoped / 64 MiB physical VMEM.
_TARGET_BLOCK_BYTES = 4 * 1024 * 1024
_UNROLL_SLICES = 16          # Python-unroll threshold for the 128-lane loop.


def _make_loss_kernel(*, tb, tt, T, nt_total, nt_inner):
    """Builds the kernel specialized to static shapes; returns (kernel, tl)."""
    fold = tt >= _LANE                    # tt is a multiple of 128 whenever >= 128
    tl = _LANE if fold else tt            # output lane width (lane-dense if possible)
    need_col_mask = (T % tt) != 0         # only the last global T-block hangs off
    n_slices = tt // _LANE

    def kernel(pred_ref, gt_ref, out_ref):
        t = pl.program_id(2)                          # local reduction index
        tg = pl.program_id(1) * nt_inner + t          # global T-block index

        # Zero the resident accumulator block at the start of each T sweep.
        @pl.when(t == 0)
        def _init():
            out_ref[...] = jnp.zeros_like(out_ref)

        # Hoisted once per grid step (broadcast is not CSE'd by JAX).
        gt = jnp.broadcast_to(gt_ref[...].astype(jnp.float32), (tb, tl))

        if not fold:
            # Tiny-T fallback (tt == T < 128): single full-block diff.
            out_ref[...] += jnp.abs(pred_ref[...].astype(jnp.float32) - gt)
            return

        def slice_contrib(start, acc, masked):
            # Stream one 128-lane slice straight from the VMEM block: no
            # full-tile f32 diff / iota temporaries are materialized.
            x = pred_ref[:, pl.ds(start, _LANE)].astype(jnp.float32)
            d = jnp.abs(x - gt)
            if masked:
                col = (lax.broadcasted_iota(jnp.int32, (1, _LANE), 1)
                       + tg * tt + start)
                d = jnp.where(col < T, d, 0.0)
            return acc + d

        def partial_sum(masked):
            acc = jnp.zeros((tb, _LANE), jnp.float32)
            if n_slices <= _UNROLL_SLICES:
                for c in range(n_slices):                      # static starts
                    acc = slice_contrib(c * _LANE, acc, masked)
            else:
                acc = lax.fori_loop(
                    0, n_slices,
                    lambda c, a: slice_contrib(
                        pl.multiple_of(c * _LANE, _LANE), a, masked),
                    acc)
            return acc

        if need_col_mask:
            # Only the last global T-block pays the iota/compare/select cost.
            @pl.when(tg == nt_total - 1)
            def _boundary():
                out_ref[...] += partial_sum(True)

            @pl.when(tg != nt_total - 1)
            def _interior():
                out_ref[...] += partial_sum(False)
        else:
            out_ref[...] += partial_sum(False)

    return kernel, tl


def _find_free_reshape(B, T):
    """Chunk TT (multiple of 128 dividing T) for a row-major reshape
    [B,T] -> [B*(T//TT), TT] restoring dense sublane packing when B is small.
    Returns None when no such chunk exists."""
    if B >= 16 or T < 1024:
        return None
    cands = [d for d in range(512, T, _LANE) if T % d == 0]
    if not cands:
        return None
    # Square-ish blocks: bring the new row count close to the 256-row tile cap.
    return min(cands, key=lambda d: abs(B * (T // d) - 256))


def _l1_sum_pallas(pred, gt):
    """sum |pred[b, t] - gt[b]| over the full [B, T] array (f32 accumulation)."""
    B, T = pred.shape
    itemsize = jnp.dtype(pred.dtype).itemsize

    # Row-reshape trick: small B wastes sublanes (bf16 min tile is (16,128))
    # and caps bytes-per-step.  A row-major reshape with a 128-multiple chunk
    # is layout plumbing (bitcast/fusible), gt is just repeated.
    TT = _find_free_reshape(B, T)
    if TT is not None:
        k = T // TT
        pred = pred.reshape(B * k, TT)
        gt = jnp.repeat(gt, k)
        B, T = B * k, TT

    # Tile policy: biggest pred block under the per-generation VMEM budget.
    tb = B if B <= 256 else 256
    if T < _LANE:
        tt = T
    else:
        tt_cap = max(_LANE,
                     (_TARGET_BLOCK_BYTES // (tb * itemsize)) // _LANE * _LANE)
        tt = min(tt_cap, (T // _LANE) * _LANE)
    nb = pl.cdiv(B, tb)
    nt = pl.cdiv(T, tt)

    # v7x megacore: with a single row-block the only long axis would be the
    # "arbitrary" reduction, so split it into a 2-way "parallel" axis (each
    # TensorCore owns half the sweep and its own output block).  No effect on
    # single-TC v5e/v6e.
    P = 2 if (nb == 1 and nt >= 2 and nt % 2 == 0) else 1
    nt_inner = nt // P

    kernel, tl = _make_loss_kernel(tb=tb, tt=tt, T=T,
                                   nt_total=nt, nt_inner=nt_inner)
    gt2 = gt.reshape(B, 1)                    # native dtype; upcast in-kernel

    # TODO(synk): pipeline_mode=pl.Buffered(3) + gt scratch would be cheap
    # insurance for very short T, but both are filler under a DMA-bound regime.
    partials = pl.pallas_call(
        kernel,
        grid=(nb, P, nt_inner),
        in_specs=[
            pl.BlockSpec((tb, tt), lambda i, p, t: (i, p * nt_inner + t)),
            pl.BlockSpec((tb, 1), lambda i, p, t: (i, 0)),
        ],
        # Output block depends only on (i, p) -> resident f32 accumulator
        # across the innermost "arbitrary" reduction axis; lane-dense width.
        out_specs=pl.BlockSpec((tb, tl), lambda i, p, t: (i, p)),
        out_shape=jax.ShapeDtypeStruct((nb * tb, P * tl), jnp.float32),
        compiler_params=pltpu.CompilerParams(
            dimension_semantics=("parallel", "parallel", "arbitrary"),
            vmem_limit_bytes=32 * 1024 * 1024),
    )(pred, gt2)

    # Rows >= B of the last row-block are padded garbage: drop them here
    # instead of masking in-kernel.  The remaining reduce is tiny.
    return jnp.sum(partials[:B])


def loss_forward(pred_mean, gt_mean, lens, masked_loss=True,
                 *, min_pallas_elements=2 * 1024 * 1024):
    """pred_mean: [B, T] float, gt_mean: [B] float, lens: [B] int."""
    B, T = pred_mean.shape

    if B * T < min_pallas_elements:
        # Below HBM-streaming scale, the pallas_call launch + per-step overhead
        # loses to a trivially fused XLA abs/mean.
        diff = jnp.abs(pred_mean.astype(jnp.float32)
                       - gt_mean.astype(jnp.float32)[:, None])
        mean_l1 = jnp.mean(diff)
    else:
        mean_l1 = _l1_sum_pallas(pred_mean, gt_mean) / jnp.float32(B * T)

    if masked_loss:
        # nn.L1Loss() already reduces to a scalar; masked_select of a scalar
        # makes mask.sum() copies, so sum()/mask.sum() cancels exactly except
        # for the 0/0 -> NaN corner case, reproduced here.
        mask_sum = jnp.sum(jnp.clip(lens.astype(jnp.int32), 0, T))
        return jnp.where(mask_sum > 0, mean_l1, jnp.float32(jnp.nan))

    # TODO(synk): masked_loss=False in the reference calls masks.sum() on None
    # and raises; only the masked_loss=True path is reproduced faithfully.
    return mean_l1


def _reference(pred_mean, gt_mean):
    return jnp.mean(jnp.abs(pred_mean.astype(jnp.float32)
                            - gt_mean.astype(jnp.float32)[:, None]))


if __name__ == "__main__":
    key = jax.random.PRNGKey(0)
    ks = jax.random.split(key, 8)

    # Case 1: tiny f32 problem, forced Pallas path (single full-array block,
    # non-folded tiny-T kernel branch).
    B1, T1 = 2, 16
    pred1 = jax.random.normal(ks[0], (B1, T1), dtype=jnp.float32)
    gt1 = jax.random.normal(ks[1], (B1,), dtype=jnp.float32)
    lens1 = jnp.array([10, 16], dtype=jnp.int32)
    out1 = jax.block_until_ready(
        loss_forward(pred1, gt1, lens1, masked_loss=True,
                     min_pallas_elements=0))
    ref1 = _reference(pred1, gt1)
    assert jnp.allclose(out1, ref1, rtol=1e-5, atol=1e-6), (out1, ref1)

    # Case 2: bf16, T not a multiple of the tile -> exercises the fori-loop
    # slice streaming, the gated boundary-column mask, the resident
    # accumulator, and the 2-way parallel reduction split (nb==1, nt==2).
    B2, T2 = 10, 3000
    pred2 = jax.random.normal(ks[2], (B2, T2), dtype=jnp.bfloat16)
    gt2 = jax.random.normal(ks[3], (B2,), dtype=jnp.bfloat16)
    lens2 = jnp.arange(1, B2 + 1, dtype=jnp.int32) * 300
    out2 = jax.block_until_ready(
        loss_forward(pred2, gt2, lens2, masked_loss=True,
                     min_pallas_elements=0))
    ref2 = _reference(pred2, gt2)
    assert jnp.allclose(out2, ref2, rtol=5e-4, atol=1e-5), (out2, ref2)

    # Case 3: small B with a 128-multiple divisor of T -> exercises the free
    # row-reshape trick ([2,4096] -> [16,512]) and the unrolled slice loop.
    B3, T3 = 2, 4096
    pred3 = jax.random.normal(ks[4], (B3, T3), dtype=jnp.float32)
    gt3 = jax.random.normal(ks[5], (B3,), dtype=jnp.float32)
    lens3 = jnp.array([4096, 2000], dtype=jnp.int32)
    out3 = jax.block_until_ready(
        loss_forward(pred3, gt3, lens3, masked_loss=True,
                     min_pallas_elements=0))
    ref3 = _reference(pred3, gt3)
    assert jnp.allclose(out3, ref3, rtol=1e-4, atol=1e-6), (out3, ref3)

    # Case 4: B > 256 -> multiple row-blocks with a ragged last block; padded
    # garbage rows are dropped by the wrapper-side partials[:B] sum.
    B4, T4 = 300, 256
    pred4 = jax.random.normal(ks[6], (B4, T4), dtype=jnp.float32)
    gt4 = jax.random.normal(ks[7], (B4,), dtype=jnp.float32)
    lens4 = jnp.full((B4,), 200, dtype=jnp.int32)
    out4 = jax.block_until_ready(
        loss_forward(pred4, gt4, lens4, masked_loss=True,
                     min_pallas_elements=0))
    ref4 = _reference(pred4, gt4)
    assert jnp.allclose(out4, ref4, rtol=1e-4, atol=1e-6), (out4, ref4)

    print("KERNEL_OK")
</pallas_src>

<mosaic_0001>
module attributes {stable_mosaic.version = 11 : i64} {
  func.func @kernel(%arg0: i32, %arg1: i32, %arg2: i32, %arg3: memref<2x16xf32, #tpu.memory_space<vmem>>, %arg4: memref<2x1xf32, #tpu.memory_space<vmem>>, %arg5: memref<2x16xf32, #tpu.memory_space<vmem>>) attributes {dimension_semantics = [#tpu.dimension_semantics<parallel>, #tpu.dimension_semantics<parallel>, #tpu.dimension_semantics<arbitrary>], iteration_bounds = array<i64: 1, 1, 1>, scalar_prefetch = 0 : i64, scratch_operands = 0 : i64, tpu.core_type = #tpu.core_type<tc>, window_params = [{transform_indices = @transform_0, window_bounds = array<i64: 2, 16>}, {transform_indices = @transform_1, window_bounds = array<i64: 2, 1>}, {transform_indices = @transform_2, window_bounds = array<i64: 2, 16>}]} {
    %c0_i32 = arith.constant 0 : i32
    %0 = arith.cmpi eq, %arg2, %c0_i32 : i32
    %1 = arith.extui %0 : i1 to i32
    %c0_i32_0 = arith.constant 0 : i32
    %2 = arith.cmpi ne, %1, %c0_i32_0 : i32
    scf.if %2 {
      %cst = arith.constant 0.000000e+00 : f32
      %12 = vector.broadcast %cst : f32 to vector<2x16xf32>
      %c0_8 = arith.constant 0 : index
      %c0_9 = arith.constant 0 : index
      %13 = vector.load %arg5[%c0_8, %c0_9] : memref<2x16xf32, #tpu.memory_space<vmem>>, vector<2x16xf32>
      tpu.vector_store %arg5[%c0_8, %c0_9], %12 {strides = array<i32>} : memref<2x16xf32, #tpu.memory_space<vmem>>, vector<2x16xf32>,
    } else {
    }
    %c0 = arith.constant 0 : index
    %c0_1 = arith.constant 0 : index
    %3 = vector.load %arg4[%c0, %c0_1] : memref<2x1xf32, #tpu.memory_space<vmem>>, vector<2x1xf32>
    %4 = vector.shape_cast %3 : vector<2x1xf32> to vector<2x1xf32>
    %5 = vector.broadcast %4 : vector<2x1xf32> to vector<2x16xf32>
    %c0_2 = arith.constant 0 : index
    %c0_3 = arith.constant 0 : index
    %6 = vector.load %arg5[%c0_2, %c0_3] : memref<2x16xf32, #tpu.memory_space<vmem>>, vector<2x16xf32>
    %c0_4 = arith.constant 0 : index
    %c0_5 = arith.constant 0 : index
    %7 = vector.load %arg3[%c0_4, %c0_5] : memref<2x16xf32, #tpu.memory_space<vmem>>, vector<2x16xf32>
    %8 = arith.subf %7, %5 : vector<2x16xf32>
    %9 = math.absf %8 : vector<2x16xf32>
    %10 = arith.addf %6, %9 : vector<2x16xf32>
    %c0_6 = arith.constant 0 : index
    %c0_7 = arith.constant 0 : index
    %11 = vector.load %arg5[%c0_6, %c0_7] : memref<2x16xf32, #tpu.memory_space<vmem>>, vector<2x16xf32>
    tpu.vector_store %arg5[%c0_6, %c0_7], %10 {strides = array<i32>} : memref<2x16xf32, #tpu.memory_space<vmem>>, vector<2x16xf32>,
    return
  }
  func.func @transform_0(%arg0: i32, %arg1: i32, %arg2: i32) -> (i32, i32) {
    %c1_i32 = arith.constant 1 : i32
    %0 = arith.muli %arg1, %c1_i32 : i32
    %1 = arith.addi %0, %arg2 : i32
    %c0_i32 = arith.constant 0 : i32
    return %arg0, %1 : i32, i32
  }
  func.func @transform_1(%arg0: i32, %arg1: i32, %arg2: i32) -> (i32, i32) {
    %c0_i32 = arith.constant 0 : i32
    %c0_i32_0 = arith.constant 0 : i32
    return %arg0, %c0_i32 : i32, i32
  }
  func.func @transform_2(%arg0: i32, %arg1: i32, %arg2: i32) -> (i32, i32) {
    %c0_i32 = arith.constant 0 : i32
    return %arg0, %arg1 : i32, i32
  }
}

</mosaic_0001>

<bundles_post_ra>
// kernel: tpu_custom_call.1
= control target key start
LH: loop header
LB: loop body
LE: loop exit
PB: predicated region body
PF: predicated region fallthrough
CT: control target
= control target key end

     0   :  { %vm33_vm0 = vcmask 123904   ;;  %v96_v1 = vmov 0   ;;  %s134_s0 = inlined_call_operand.vmem [shape: f32[2,16], index: 0, kind: input, shape index: {}]   ;;  %s135_s1 = inlined_call_operand.vmem [shape: f32[2,1], index: 1, kind: input, shape index: {}]   ;;  %s136_s2 = inlined_call_operand.hbm [shape: f32[2,16], index: 2, kind: output, shape index: {}]  }
   0x1   :  { %v35_v0 = vld [vmem:[%s135_s1] sm:$0x3]  ;;  %71 = vset.pattern.permute.xlu0 %v96_v1 }
   0x2   :  { %7 = vsyncpa [#allocation3], 0  ;;  %38 = vperm.xlu0 %71, %v35_v0   ;;  %v97_v2 = vmov 0.0   ;;  %v42_v3 = vld [vmem:[%s134_s0] sm:$0x3]  ;;  %s98_s13 = smov [#allocation2]  }
   0x3   :  { %34 = vst.msk [vmem:[#allocation2] sm:$0x3] %vm33_vm0, %v97_v2  ;;  %s54_s14 = sshll.u32 %s98_s13, 4  ;;  %s55_s14 = int_to_ptr.vmem [resolvable:$true] %s54_s14 }
   0x4   :  { %s72_s1 = scalar_lea.vmem %s55_s14, 32  ;;  %p77_p1 = scmp.lt.s32.totalorder %s55_s14, %s55_s14 }
   0x5   :  { %p73_p0 = scmp.ne.s32.totalorder %s55_s14, %s72_s1  ;;  %p78_p2 = scmp.lt.s32.totalorder %s72_s1, %s72_s1 }
   0x7   :  { %p79_p3 = por %p78_p2, %p77_p1 }
   0x9   :  { %p80_p4 = pnand %p79_p3, %p73_p0 }
   0xa   :  { %v41_v6 = vld [vmem:[#allocation2] sm:$0x3] }
  0x81   :  { %v39_v4 = vpop.permute.xlu0 %38 }
  0x82   :  { %v43_v5 = vsub.f32 %v42_v3, %v39_v4 }
  0x84   :  { %v44_v7 = vand.u32 2147483647, %v43_v5 }
  0x86   :  { %v45_v8 = vadd.f32 %v44_v7, %v41_v6 }
  0x88   :  { %47 = vst.msk [vmem:[#allocation2] sm:$0x3] %vm33_vm0, %v45_v8 }
  0x89   :  { %83 = shalt.err (!%p80_p4)
}
  0x8a   :  { %s84_s0 = scalar_lea.hbm %s136_s2, 32 }
  0x8b   :  { %p85_p5 = scmp.ne.s32.totalorder %s136_s2, %s84_s0  ;;  %p88_p6 = scmp.lt.u32.totalorder %s84_s0, %s136_s2 }
  0x8d   :  { %p90_p7 = pnand %p88_p6, %p85_p5 }
  0x8f   :  { %93 = shalt.err (!%p90_p7)
}
  0x90   :  { %57 = dma.vmem_to_hbm [thread:$0]  %s55_s14, 32, %s136_s2, [#allocation3]  }
  0x91   :  { %94 = dma.done.wait [#allocation3], 32  }
  0x92   :  { %95 = vsyncadd [#allocation3], 4294967264 }
  0x93   :  { %61 = vsyncpa [#allocation3], 1 }

</bundles_post_ra>
